<compile_context>
chip_gen: v6e
topology: v6e:2x2x1
jax: 0.10.0
libtpu: 0.0.40
codegen_flags: <defaults>
</compile_context>

<pallas_src>
import jax
import jax.numpy as jnp
from jax.experimental import pallas as pl
from jax.experimental.pallas import tpu as pltpu

BN_EPS = 1e-5


# --------------------------------------------------------------------------
# shared in-kernel helpers
# --------------------------------------------------------------------------

def _edge_masks(bb, L):
    """(N, 1) masks for the first/last position of each length-L segment."""
    lpos = jax.lax.broadcasted_iota(jnp.int32, (bb, L, 1), 1).reshape(bb * L, 1)
    return lpos == 0, lpos == (L - 1)


def _conv3_taps(v, w_ref, is_first, is_last):
    """3-tap 'same' conv along the flattened row axis.

    Three accumulated MXU dots on roll+mask shifted taps (no im2col slab).
    w_ref has shape (3, C_in, C_out); tap k multiplies x[l + k - 1].  The
    circular wrap of the roll lands exactly on masked rows, reproducing the
    zero padding of Conv1d(padding=1) independently per batch segment.
    """
    N = v.shape[0]
    wdt = w_ref.dtype
    vm1 = jnp.where(is_first, 0.0, pltpu.roll(v, shift=1, axis=0))      # x[l-1]
    vp1 = jnp.where(is_last, 0.0, pltpu.roll(v, shift=N - 1, axis=0))   # x[l+1]
    acc = jnp.dot(v.astype(wdt), w_ref[1], preferred_element_type=jnp.float32)
    acc = acc + jnp.dot(vm1.astype(wdt), w_ref[0], preferred_element_type=jnp.float32)
    acc = acc + jnp.dot(vp1.astype(wdt), w_ref[2], preferred_element_type=jnp.float32)
    return acc


# --------------------------------------------------------------------------
# fused single-call path (small shapes: everything resident in VMEM)
# --------------------------------------------------------------------------

def _fused_kernel(x_ref, w1_ref, w2_ref, g1_ref, b1_ref, g2_ref, b2_ref,
                  fc1w_ref, fc1b_ref, fc2w_ref, fc2b_ref, o_ref):
    B, L, C = x_ref.shape
    N = B * L
    is_first, is_last = _edge_masks(B, L)
    x = x_ref[...].astype(jnp.float32).reshape(N, C)

    def bn_train(v, g_ref, b_ref):
        # Two-pass batch statistics (matches PyTorch training-mode math and
        # avoids the E[x^2]-E[x]^2 cancellation concern).
        mean = jnp.mean(v, axis=0, keepdims=True)                       # (1, C)
        var = jnp.mean((v - mean) ** 2, axis=0, keepdims=True)          # biased
        scale = g_ref[...] * jax.lax.rsqrt(var + BN_EPS)
        shift = b_ref[...] - mean * scale
        return v * scale + shift

    # conv1 -> relu -> bn1 -> conv2 -> bn2  (exact module order)
    h = _conv3_taps(x, w1_ref, is_first, is_last)
    h = jnp.maximum(h, 0.0)
    h = bn_train(h, g1_ref, b1_ref)
    h = _conv3_taps(h, w2_ref, is_first, is_last)
    h = bn_train(h, g2_ref, b2_ref)

    # SE: squeeze (mean over L) -> FC -> relu -> FC -> sigmoid -> excite
    h3 = h.reshape(B, L, C)
    y = jnp.mean(h3, axis=1)                                            # (B, C)
    z = jnp.dot(y, fc1w_ref[...], preferred_element_type=jnp.float32) + fc1b_ref[...]
    z = jnp.maximum(z, 0.0)                                             # (B, Hpad)
    s = jnp.dot(z, fc2w_ref[...], preferred_element_type=jnp.float32) + fc2b_ref[...]
    s = jax.nn.sigmoid(s)                                               # (B, C)
    h3 = h3 * s[:, None, :]

    # residual add (x re-read from its VMEM ref) + final relu
    o_ref[...] = jnp.maximum(h3 + x_ref[...].astype(jnp.float32), 0.0).astype(o_ref.dtype)


def _fused_forward(x, pp, cap):
    B, L, C = x.shape
    args = (x, pp["w1"], pp["w2"], pp["g1"], pp["b1"], pp["g2"], pp["b2"],
            pp["fc1w"], pp["fc1b"], pp["fc2w"], pp["fc2b"])
    vspec = pl.BlockSpec(memory_space=pltpu.MemorySpace.VMEM)
    return pl.pallas_call(
        _fused_kernel,
        out_shape=jax.ShapeDtypeStruct((B, L, C), x.dtype),
        in_specs=[vspec] * len(args),
        out_specs=vspec,
        compiler_params=pltpu.CompilerParams(vmem_limit_bytes=cap),
    )(*args)


# --------------------------------------------------------------------------
# tiled 3-pass path (batch-block grid, "parallel" semantics)
# --------------------------------------------------------------------------

def _conv1_stats_kernel(x_ref, w1_ref, t1_ref, st_ref):
    bb, L, C = x_ref.shape
    N = bb * L
    is_first, is_last = _edge_masks(bb, L)
    v = x_ref[...].astype(jnp.float32).reshape(N, C)
    t1 = jnp.maximum(_conv3_taps(v, w1_ref, is_first, is_last), 0.0)    # relu(conv1)
    t1_ref[...] = t1.reshape(bb, L, C).astype(t1_ref.dtype)
    # per-block partial BN1 stats (combined across blocks in the wrapper)
    st_ref[0] = jnp.concatenate(
        [jnp.sum(t1, axis=0, keepdims=True),
         jnp.sum(t1 * t1, axis=0, keepdims=True)], axis=0)


def _bn1_conv2_stats_kernel(t1_ref, s1_ref, sh1_ref, w2_ref,
                            h2_ref, st_ref, se_ref):
    bb, L, C = t1_ref.shape
    N = bb * L
    is_first, is_last = _edge_masks(bb, L)
    h1 = t1_ref[...].astype(jnp.float32).reshape(N, C) * s1_ref[...] + sh1_ref[...]
    h2 = _conv3_taps(h1, w2_ref, is_first, is_last)                     # conv2(bn1(.))
    h2_ref[...] = h2.reshape(bb, L, C).astype(h2_ref.dtype)
    # per-block partial BN2 stats + per-batch sums over L for the SE squeeze
    st_ref[0] = jnp.concatenate(
        [jnp.sum(h2, axis=0, keepdims=True),
         jnp.sum(h2 * h2, axis=0, keepdims=True)], axis=0)
    se_ref[0] = jnp.sum(h2.reshape(bb, L, C), axis=1)                   # (bb, C)


def _excite_residual_kernel(h2_ref, x_ref, a_ref, d_ref, o_ref):
    # out = relu(bn2(h2) * se_scale + x) with bn2+se folded into per-batch A, D
    h2 = h2_ref[...].astype(jnp.float32)
    x = x_ref[...].astype(jnp.float32)
    a = a_ref[0][:, None, :]
    d = d_ref[0][:, None, :]
    o_ref[...] = jnp.maximum(h2 * a + d + x, 0.0).astype(o_ref.dtype)


def _auto_batch_block(B, L, C, cap):
    per_batch = L * C * 4
    bb = max(1, min(B, (cap // 4) // max(1, 8 * per_batch)))
    while B % bb:
        bb -= 1
    return bb


def _tiled_forward(x, pp, cap, batch_block):
    B, L, C = x.shape
    bb = batch_block if batch_block is not None else _auto_batch_block(B, L, C, cap)
    if bb < 1 or B % bb != 0:
        bb = 1
    nblk = B // bb
    grid = (nblk,)
    n_total = float(B * L)
    inter_dt = pp["w1"].dtype            # bf16 intermediates when bf16 matmuls

    tile_spec = pl.BlockSpec((bb, L, C), lambda i: (i, 0, 0))
    stat_spec = pl.BlockSpec((1, 2, C), lambda i: (i, 0, 0))
    perb_spec = pl.BlockSpec((1, bb, C), lambda i: (i, 0, 0))
    w_spec = pl.BlockSpec((3, C, C), lambda i: (0, 0, 0))
    row_spec = pl.BlockSpec((1, C), lambda i: (0, 0))
    cparams = pltpu.CompilerParams(dimension_semantics=("parallel",),
                                   vmem_limit_bytes=cap)

    # ---- pass 1: relu(conv1(x)) + per-block BN1 partial stats ----
    t1, st1 = pl.pallas_call(
        _conv1_stats_kernel,
        grid=grid,
        in_specs=[tile_spec, w_spec],
        out_specs=(tile_spec, stat_spec),
        out_shape=(jax.ShapeDtypeStruct((B, L, C), inter_dt),
                   jax.ShapeDtypeStruct((nblk, 2, C), jnp.float32)),
        compiler_params=cparams,
    )(x, pp["w1"])

    mean1 = jnp.sum(st1[:, 0, :], axis=0) / n_total
    var1 = jnp.maximum(jnp.sum(st1[:, 1, :], axis=0) / n_total - mean1 * mean1, 0.0)
    s1 = (pp["g1"][0] * jax.lax.rsqrt(var1 + BN_EPS)).reshape(1, C)
    sh1 = (pp["b1"][0] - mean1 * s1[0]).reshape(1, C)

    # ---- pass 2: conv2(bn1(t1)) + per-block BN2 partial stats + SE sums ----
    h2, st2, sesum = pl.pallas_call(
        _bn1_conv2_stats_kernel,
        grid=grid,
        in_specs=[tile_spec, row_spec, row_spec, w_spec],
        out_specs=(tile_spec, stat_spec, perb_spec),
        out_shape=(jax.ShapeDtypeStruct((B, L, C), inter_dt),
                   jax.ShapeDtypeStruct((nblk, 2, C), jnp.float32),
                   jax.ShapeDtypeStruct((nblk, bb, C), jnp.float32)),
        compiler_params=cparams,
    )(t1, s1, sh1, pp["w2"])

    mean2 = jnp.sum(st2[:, 0, :], axis=0) / n_total
    var2 = jnp.maximum(jnp.sum(st2[:, 1, :], axis=0) / n_total - mean2 * mean2, 0.0)
    s2 = pp["g2"][0] * jax.lax.rsqrt(var2 + BN_EPS)                     # (C,)
    sh2 = pp["b2"][0] - mean2 * s2                                      # (C,)

    # tiny SE MLP on the per-batch means of bn2(h2)  (O(B*C) JAX glue)
    y = sesum.reshape(B, C) / L * s2 + sh2                              # (B, C)
    z = jnp.maximum(y @ pp["fc1w_t"] + pp["fc1b_v"], 0.0)
    se = jax.nn.sigmoid(z @ pp["fc2w_t"] + pp["fc2b_v"])                # (B, C)
    A = (se * s2).astype(jnp.float32).reshape(nblk, bb, C)
    D = (se * sh2).astype(jnp.float32).reshape(nblk, bb, C)

    # ---- pass 3: excite + residual + final relu ----
    return pl.pallas_call(
        _excite_residual_kernel,
        grid=grid,
        in_specs=[tile_spec, tile_spec, perb_spec, perb_spec],
        out_specs=tile_spec,
        out_shape=jax.ShapeDtypeStruct((B, L, C), x.dtype),
        compiler_params=cparams,
    )(h2, x, A, D)


# --------------------------------------------------------------------------
# wrappers
# --------------------------------------------------------------------------

def _vmem_budget_bytes():
    """Generation-aware VMEM budget (7/8 of physical; ~112 MiB v5e/v6e, ~56 MiB v7x)."""
    cap = 64 << 20
    try:
        info = pltpu.get_tpu_info()
        cap = int(getattr(info, "vmem_capacity_bytes", cap)) or cap
    except Exception:
        pass
    return (cap // 8) * 7


def pack_params(params, *, use_bf16_matmul=True):
    """One-time parameter repacking (hoisted out of the per-call wrapper).

    Conv weights -> (3, C_in, C_out) taps in the matmul operand dtype (bf16 by
    default on every generation; f32 accumulation happens on the MXU either
    way).  SE weights are lane-padded for the fused kernel and kept unpadded
    for the tiled path's tiny host-side SE MLP.
    """
    C = params["conv1_w"].shape[0]
    hidden = params["fc1_w"].shape[0]
    hpad = ((hidden + 127) // 128) * 128
    wdt = jnp.bfloat16 if use_bf16_matmul else jnp.float32
    w1 = jnp.transpose(params["conv1_w"], (2, 1, 0)).astype(wdt)        # (3, Cin, Cout)
    w2 = jnp.transpose(params["conv2_w"], (2, 1, 0)).astype(wdt)
    fc1w = jnp.zeros((C, hpad), jnp.float32).at[:, :hidden].set(params["fc1_w"].T)
    fc1b = jnp.zeros((1, hpad), jnp.float32).at[:, :hidden].set(params["fc1_b"])
    fc2w = jnp.zeros((hpad, C), jnp.float32).at[:hidden, :].set(params["fc2_w"].T)
    return {
        "w1": w1, "w2": w2,
        "g1": params["bn1_g"].reshape(1, C), "b1": params["bn1_b"].reshape(1, C),
        "g2": params["bn2_g"].reshape(1, C), "b2": params["bn2_b"].reshape(1, C),
        "fc1w": fc1w, "fc1b": fc1b, "fc2w": fc2w,
        "fc2b": params["fc2_b"].reshape(1, C),
        "fc1w_t": params["fc1_w"].T, "fc1b_v": params["fc1_b"],
        "fc2w_t": params["fc2_w"].T, "fc2b_v": params["fc2_b"],
    }


def res_se_block_nlc(x_nlc, packed, *, batch_block=None, force_tiled=None):
    """Channels-last (B, L, C) forward.  Picks fused vs tiled from the VMEM budget."""
    B, L, C = x_nlc.shape
    cap = _vmem_budget_bytes()
    w_keys = ("w1", "w2", "g1", "b1", "g2", "b2", "fc1w", "fc1b", "fc2w", "fc2b")
    w_bytes = sum(int(packed[k].size) * packed[k].dtype.itemsize for k in w_keys)
    fused_est = 8 * B * L * C * 4 + w_bytes + (2 << 20)   # x + out + ~6 live (N,C) f32
    use_tiled = (fused_est > cap) if force_tiled is None else bool(force_tiled)
    if use_tiled:
        return _tiled_forward(x_nlc, packed, cap, batch_block)
    return _fused_forward(x_nlc, packed, cap)


def res_se_block(x_ncl, packed, **kw):
    """PyTorch Conv1d layout NCL (B, C, L) convenience wrapper."""
    out_nlc = res_se_block_nlc(jnp.transpose(x_ncl, (0, 2, 1)), packed, **kw)
    return jnp.transpose(out_nlc, (0, 2, 1))


# --------------------------------------------------------------------------
# pure-JAX reference (high precision) + param init
# --------------------------------------------------------------------------

def res_se_block_ref(x, p):
    hp = jax.lax.Precision.HIGHEST

    def conv3(h, w):
        return jax.lax.conv_general_dilated(
            h, w, window_strides=(1,), padding=((1, 1),),
            dimension_numbers=("NCH", "OIH", "NCH"), precision=hp)

    def bn(h, g, b):
        mean = jnp.mean(h, axis=(0, 2), keepdims=True)
        var = jnp.mean((h - mean) ** 2, axis=(0, 2), keepdims=True)
        return (h - mean) / jnp.sqrt(var + BN_EPS) * g[None, :, None] + b[None, :, None]

    h = conv3(x, p["conv1_w"])
    h = jnp.maximum(h, 0.0)
    h = bn(h, p["bn1_g"], p["bn1_b"])
    h = conv3(h, p["conv2_w"])
    h = bn(h, p["bn2_g"], p["bn2_b"])
    y = jnp.mean(h, axis=2)
    z = jnp.maximum(jnp.dot(y, p["fc1_w"].T, precision=hp) + p["fc1_b"], 0.0)
    s = jax.nn.sigmoid(jnp.dot(z, p["fc2_w"].T, precision=hp) + p["fc2_b"])
    h = h * s[:, :, None]
    return jnp.maximum(h + x, 0.0)


def make_params(key, channels, reduction):
    hidden = channels // reduction
    ks = jax.random.split(key, 8)
    return {
        "conv1_w": 0.2 * jax.random.normal(ks[0], (channels, channels, 3), jnp.float32),
        "conv2_w": 0.2 * jax.random.normal(ks[1], (channels, channels, 3), jnp.float32),
        "bn1_g": 1.0 + 0.1 * jax.random.normal(ks[2], (channels,), jnp.float32),
        "bn1_b": 0.1 * jax.random.normal(ks[3], (channels,), jnp.float32),
        "bn2_g": 1.0 + 0.1 * jax.random.normal(ks[4], (channels,), jnp.float32),
        "bn2_b": 0.1 * jax.random.normal(ks[5], (channels,), jnp.float32),
        "fc1_w": 0.3 * jax.random.normal(ks[6], (hidden, channels), jnp.float32),
        "fc1_b": jnp.zeros((hidden,), jnp.float32),
        "fc2_w": 0.3 * jax.random.normal(ks[7], (channels, hidden), jnp.float32),
        "fc2_b": jnp.zeros((channels,), jnp.float32),
    }


if __name__ == "__main__":
    B, C, L = 2, 16, 16          # Conv1d input is (N, C, L); reduction=8 -> hidden=2
    reduction = 8

    key = jax.random.PRNGKey(0)
    kx, kp = jax.random.split(key)
    x = jax.random.normal(kx, (B, C, L), jnp.float32)
    params = make_params(kp, C, reduction)
    ref = jax.block_until_ready(res_se_block_ref(x, params))

    # Tolerances: MXU matmuls round operands (even "f32" dots use reduced
    # operand precision on TPU by default), so allow a few e-2 in f32 mode and
    # more with explicit bf16 operands / bf16 HBM intermediates.
    checks = [
        ("fused_f32", False, False, 6e-2),
        ("tiled_f32", False, True, 6e-2),
        ("fused_bf16", True, False, 1.5e-1),
        ("tiled_bf16", True, True, 1.5e-1),
    ]
    for name, use_bf16, tiled, tol in checks:
        packed = pack_params(params, use_bf16_matmul=use_bf16)
        out = jax.block_until_ready(
            res_se_block(x, packed, force_tiled=tiled, batch_block=1))
        assert out.shape == (B, C, L) and out.dtype == jnp.float32, name
        err = float(jnp.max(jnp.abs(out - ref)))
        assert err < tol, f"{name}: max abs err {err} >= {tol}"

    print("KERNEL_OK")
</pallas_src>

<mosaic_0001>
module attributes {stable_mosaic.version = 11 : i64} {
  func.func @_fused_kernel(%arg0: memref<2x16x16xf32, #tpu.memory_space<vmem>>, %arg1: memref<3x16x16xf32, #tpu.memory_space<vmem>>, %arg2: memref<3x16x16xf32, #tpu.memory_space<vmem>>, %arg3: memref<1x16xf32, #tpu.memory_space<vmem>>, %arg4: memref<1x16xf32, #tpu.memory_space<vmem>>, %arg5: memref<1x16xf32, #tpu.memory_space<vmem>>, %arg6: memref<1x16xf32, #tpu.memory_space<vmem>>, %arg7: memref<16x128xf32, #tpu.memory_space<vmem>>, %arg8: memref<1x128xf32, #tpu.memory_space<vmem>>, %arg9: memref<128x16xf32, #tpu.memory_space<vmem>>, %arg10: memref<1x16xf32, #tpu.memory_space<vmem>>, %arg11: memref<2x16x16xf32, #tpu.memory_space<vmem>>) attributes {dimension_semantics = [], scalar_prefetch = 0 : i64, scratch_operands = 0 : i64, tpu.core_type = #tpu.core_type<tc>} {
    %0 = tpu.iota {dimensions = array<i32: 1>} : vector<2x16x1xi32>
    %1 = vector.shape_cast %0 : vector<2x16x1xi32> to vector<32x1xi32>
    %c0_i32 = arith.constant 0 : i32
    %2 = vector.broadcast %c0_i32 : i32 to vector<32x1xi32>
    %3 = arith.cmpi eq, %1, %2 : vector<32x1xi32>
    %c15_i32 = arith.constant 15 : i32
    %4 = vector.broadcast %c15_i32 : i32 to vector<32x1xi32>
    %5 = arith.cmpi eq, %1, %4 : vector<32x1xi32>
    %c0 = arith.constant 0 : index
    %c0_0 = arith.constant 0 : index
    %c0_1 = arith.constant 0 : index
    %6 = vector.load %arg0[%c0, %c0_0, %c0_1] : memref<2x16x16xf32, #tpu.memory_space<vmem>>, vector<2x16x16xf32>
    %7 = vector.shape_cast %6 : vector<2x16x16xf32> to vector<32x16xf32>
    %c1_i32 = arith.constant 1 : i32
    %8 = tpu.dynamic_rotate %7 by %c1_i32 dim 0 : vector<32x16xf32>, i32 -> vector<32x16xf32>
    %cst = arith.constant 0.000000e+00 : f32
    %9 = vector.shape_cast %3 : vector<32x1xi1> to vector<32x1xi1>
    %10 = vector.broadcast %9 : vector<32x1xi1> to vector<32x16xi1>
    %11 = vector.broadcast %cst : f32 to vector<32x16xf32>
    %12 = arith.select %10, %11, %8 : vector<32x16xi1>, vector<32x16xf32>
    %c31_i32 = arith.constant 31 : i32
    %13 = tpu.dynamic_rotate %7 by %c31_i32 dim 0 : vector<32x16xf32>, i32 -> vector<32x16xf32>
    %cst_2 = arith.constant 0.000000e+00 : f32
    %14 = vector.shape_cast %5 : vector<32x1xi1> to vector<32x1xi1>
    %15 = vector.broadcast %14 : vector<32x1xi1> to vector<32x16xi1>
    %16 = vector.broadcast %cst_2 : f32 to vector<32x16xf32>
    %17 = arith.select %15, %16, %13 : vector<32x16xi1>, vector<32x16xf32>
    %c1 = arith.constant 1 : index
    %c0_3 = arith.constant 0 : index
    %c0_4 = arith.constant 0 : index
    %18 = vector.load %arg1[%c1, %c0_3, %c0_4] : memref<3x16x16xf32, #tpu.memory_space<vmem>>, vector<1x16x16xf32>
    %19 = vector.shape_cast %18 : vector<1x16x16xf32> to vector<16x16xf32>
    %cst_5 = arith.constant dense<0.000000e+00> : vector<32x16xf32>
    %20 = tpu.matmul %7, %19, %cst_5 {dimension_numbers = #tpu.dot_dimension_numbers<[1], [0], [0], [1], [0, 0, 1, 1], [], []>} : vector<32x16xf32>, vector<16x16xf32>, vector<32x16xf32> -> vector<32x16xf32>
    %c0_6 = arith.constant 0 : index
    %c0_7 = arith.constant 0 : index
    %c0_8 = arith.constant 0 : index
    %21 = vector.load %arg1[%c0_6, %c0_7, %c0_8] : memref<3x16x16xf32, #tpu.memory_space<vmem>>, vector<1x16x16xf32>
    %22 = vector.shape_cast %21 : vector<1x16x16xf32> to vector<16x16xf32>
    %cst_9 = arith.constant dense<0.000000e+00> : vector<32x16xf32>
    %23 = tpu.matmul %12, %22, %cst_9 {dimension_numbers = #tpu.dot_dimension_numbers<[1], [0], [0], [1], [0, 0, 1, 1], [], []>} : vector<32x16xf32>, vector<16x16xf32>, vector<32x16xf32> -> vector<32x16xf32>
    %24 = arith.addf %20, %23 : vector<32x16xf32>
    %c2 = arith.constant 2 : index
    %c0_10 = arith.constant 0 : index
    %c0_11 = arith.constant 0 : index
    %25 = vector.load %arg1[%c2, %c0_10, %c0_11] : memref<3x16x16xf32, #tpu.memory_space<vmem>>, vector<1x16x16xf32>
    %26 = vector.shape_cast %25 : vector<1x16x16xf32> to vector<16x16xf32>
    %cst_12 = arith.constant dense<0.000000e+00> : vector<32x16xf32>
    %27 = tpu.matmul %17, %26, %cst_12 {dimension_numbers = #tpu.dot_dimension_numbers<[1], [0], [0], [1], [0, 0, 1, 1], [], []>} : vector<32x16xf32>, vector<16x16xf32>, vector<32x16xf32> -> vector<32x16xf32>
    %28 = arith.addf %24, %27 : vector<32x16xf32>
    %cst_13 = arith.constant 0.000000e+00 : f32
    %29 = vector.broadcast %cst_13 : f32 to vector<32x16xf32>
    %30 = arith.maximumf %28, %29 : vector<32x16xf32>
    %cst_14 = arith.constant dense<0.000000e+00> : vector<16xf32>
    %31 = vector.multi_reduction <add>, %30, %cst_14 [0] : vector<32x16xf32> to vector<16xf32>
    %32 = vector.shape_cast %31 : vector<16xf32> to vector<1x16xf32>
    %cst_15 = arith.constant 3.200000e+01 : f32
    %33 = vector.broadcast %cst_15 : f32 to vector<1x16xf32>
    %34 = arith.divf %32, %33 : vector<1x16xf32>
    %35 = vector.broadcast %34 : vector<1x16xf32> to vector<32x16xf32>
    %36 = arith.subf %30, %35 : vector<32x16xf32>
    %37 = arith.mulf %36, %36 : vector<32x16xf32>
    %cst_16 = arith.constant dense<0.000000e+00> : vector<16xf32>
    %38 = vector.multi_reduction <add>, %37, %cst_16 [0] : vector<32x16xf32> to vector<16xf32>
    %39 = vector.shape_cast %38 : vector<16xf32> to vector<1x16xf32>
    %cst_17 = arith.constant 3.200000e+01 : f32
    %40 = vector.broadcast %cst_17 : f32 to vector<1x16xf32>
    %41 = arith.divf %39, %40 : vector<1x16xf32>
    %c0_18 = arith.constant 0 : index
    %c0_19 = arith.constant 0 : index
    %42 = vector.load %arg3[%c0_18, %c0_19] : memref<1x16xf32, #tpu.memory_space<vmem>>, vector<1x16xf32>
    %cst_20 = arith.constant 9.99999974E-6 : f32
    %43 = vector.broadcast %cst_20 : f32 to vector<1x16xf32>
    %44 = arith.addf %41, %43 : vector<1x16xf32>
    %45 = math.rsqrt %44 : vector<1x16xf32>
    %46 = arith.mulf %42, %45 : vector<1x16xf32>
    %c0_21 = arith.constant 0 : index
    %c0_22 = arith.constant 0 : index
    %47 = vector.load %arg4[%c0_21, %c0_22] : memref<1x16xf32, #tpu.memory_space<vmem>>, vector<1x16xf32>
    %48 = arith.mulf %34, %46 : vector<1x16xf32>
    %49 = arith.subf %47, %48 : vector<1x16xf32>
    %50 = vector.broadcast %46 : vector<1x16xf32> to vector<32x16xf32>
    %51 = arith.mulf %30, %50 : vector<32x16xf32>
    %52 = vector.broadcast %49 : vector<1x16xf32> to vector<32x16xf32>
    %53 = arith.addf %51, %52 : vector<32x16xf32>
    %c1_i32_23 = arith.constant 1 : i32
    %54 = tpu.dynamic_rotate %53 by %c1_i32_23 dim 0 : vector<32x16xf32>, i32 -> vector<32x16xf32>
    %cst_24 = arith.constant 0.000000e+00 : f32
    %55 = vector.shape_cast %3 : vector<32x1xi1> to vector<32x1xi1>
    %56 = vector.broadcast %55 : vector<32x1xi1> to vector<32x16xi1>
    %57 = vector.broadcast %cst_24 : f32 to vector<32x16xf32>
    %58 = arith.select %56, %57, %54 : vector<32x16xi1>, vector<32x16xf32>
    %c31_i32_25 = arith.constant 31 : i32
    %59 = tpu.dynamic_rotate %53 by %c31_i32_25 dim 0 : vector<32x16xf32>, i32 -> vector<32x16xf32>
    %cst_26 = arith.constant 0.000000e+00 : f32
    %60 = vector.shape_cast %5 : vector<32x1xi1> to vector<32x1xi1>
    %61 = vector.broadcast %60 : vector<32x1xi1> to vector<32x16xi1>
    %62 = vector.broadcast %cst_26 : f32 to vector<32x16xf32>
    %63 = arith.select %61, %62, %59 : vector<32x16xi1>, vector<32x16xf32>
    %c1_27 = arith.constant 1 : index
    %c0_28 = arith.constant 0 : index
    %c0_29 = arith.constant 0 : index
    %64 = vector.load %arg2[%c1_27, %c0_28, %c0_29] : memref<3x16x16xf32, #tpu.memory_space<vmem>>, vector<1x16x16xf32>
    %65 = vector.shape_cast %64 : vector<1x16x16xf32> to vector<16x16xf32>
    %cst_30 = arith.constant dense<0.000000e+00> : vector<32x16xf32>
    %66 = tpu.matmul %53, %65, %cst_30 {dimension_numbers = #tpu.dot_dimension_numbers<[1], [0], [0], [1], [0, 0, 1, 1], [], []>} : vector<32x16xf32>, vector<16x16xf32>, vector<32x16xf32> -> vector<32x16xf32>
    %c0_31 = arith.constant 0 : index
    %c0_32 = arith.constant 0 : index
    %c0_33 = arith.constant 0 : index
    %67 = vector.load %arg2[%c0_31, %c0_32, %c0_33] : memref<3x16x16xf32, #tpu.memory_space<vmem>>, vector<1x16x16xf32>
    %68 = vector.shape_cast %67 : vector<1x16x16xf32> to vector<16x16xf32>
    %cst_34 = arith.constant dense<0.000000e+00> : vector<32x16xf32>
    %69 = tpu.matmul %58, %68, %cst_34 {dimension_numbers = #tpu.dot_dimension_numbers<[1], [0], [0], [1], [0, 0, 1, 1], [], []>} : vector<32x16xf32>, vector<16x16xf32>, vector<32x16xf32> -> vector<32x16xf32>
    %70 = arith.addf %66, %69 : vector<32x16xf32>
    %c2_35 = arith.constant 2 : index
    %c0_36 = arith.constant 0 : index
    %c0_37 = arith.constant 0 : index
    %71 = vector.load %arg2[%c2_35, %c0_36, %c0_37] : memref<3x16x16xf32, #tpu.memory_space<vmem>>, vector<1x16x16xf32>
    %72 = vector.shape_cast %71 : vector<1x16x16xf32> to vector<16x16xf32>
    %cst_38 = arith.constant dense<0.000000e+00> : vector<32x16xf32>
    %73 = tpu.matmul %63, %72, %cst_38 {dimension_numbers = #tpu.dot_dimension_numbers<[1], [0], [0], [1], [0, 0, 1, 1], [], []>} : vector<32x16xf32>, vector<16x16xf32>, vector<32x16xf32> -> vector<32x16xf32>
    %74 = arith.addf %70, %73 : vector<32x16xf32>
    %cst_39 = arith.constant dense<0.000000e+00> : vector<16xf32>
    %75 = vector.multi_reduction <add>, %74, %cst_39 [0] : vector<32x16xf32> to vector<16xf32>
    %76 = vector.shape_cast %75 : vector<16xf32> to vector<1x16xf32>
    %cst_40 = arith.constant 3.200000e+01 : f32
    %77 = vector.broadcast %cst_40 : f32 to vector<1x16xf32>
    %78 = arith.divf %76, %77 : vector<1x16xf32>
    %79 = vector.broadcast %78 : vector<1x16xf32> to vector<32x16xf32>
    %80 = arith.subf %74, %79 : vector<32x16xf32>
    %81 = arith.mulf %80, %80 : vector<32x16xf32>
    %cst_41 = arith.constant dense<0.000000e+00> : vector<16xf32>
    %82 = vector.multi_reduction <add>, %81, %cst_41 [0] : vector<32x16xf32> to vector<16xf32>
    %83 = vector.shape_cast %82 : vector<16xf32> to vector<1x16xf32>
    %cst_42 = arith.constant 3.200000e+01 : f32
    %84 = vector.broadcast %cst_42 : f32 to vector<1x16xf32>
    %85 = arith.divf %83, %84 : vector<1x16xf32>
    %c0_43 = arith.constant 0 : index
    %c0_44 = arith.constant 0 : index
    %86 = vector.load %arg5[%c0_43, %c0_44] : memref<1x16xf32, #tpu.memory_space<vmem>>, vector<1x16xf32>
    %cst_45 = arith.constant 9.99999974E-6 : f32
    %87 = vector.broadcast %cst_45 : f32 to vector<1x16xf32>
    %88 = arith.addf %85, %87 : vector<1x16xf32>
    %89 = math.rsqrt %88 : vector<1x16xf32>
    %90 = arith.mulf %86, %89 : vector<1x16xf32>
    %c0_46 = arith.constant 0 : index
    %c0_47 = arith.constant 0 : index
    %91 = vector.load %arg6[%c0_46, %c0_47] : memref<1x16xf32, #tpu.memory_space<vmem>>, vector<1x16xf32>
    %92 = arith.mulf %78, %90 : vector<1x16xf32>
    %93 = arith.subf %91, %92 : vector<1x16xf32>
    %94 = vector.broadcast %90 : vector<1x16xf32> to vector<32x16xf32>
    %95 = arith.mulf %74, %94 : vector<32x16xf32>
    %96 = vector.broadcast %93 : vector<1x16xf32> to vector<32x16xf32>
    %97 = arith.addf %95, %96 : vector<32x16xf32>
    %98 = vector.shape_cast %97 : vector<32x16xf32> to vector<2x16x16xf32>
    %cst_48 = arith.constant dense<0.000000e+00> : vector<2x16xf32>
    %99 = vector.multi_reduction <add>, %98, %cst_48 [1] : vector<2x16x16xf32> to vector<2x16xf32>
    %cst_49 = arith.constant 1.600000e+01 : f32
    %100 = vector.broadcast %cst_49 : f32 to vector<2x16xf32>
    %101 = arith.divf %99, %100 : vector<2x16xf32>
    %c0_50 = arith.constant 0 : index
    %c0_51 = arith.constant 0 : index
    %102 = vector.load %arg7[%c0_50, %c0_51] : memref<16x128xf32, #tpu.memory_space<vmem>>, vector<16x128xf32>
    %cst_52 = arith.constant dense<0.000000e+00> : vector<2x128xf32>
    %103 = tpu.matmul %101, %102, %cst_52 {dimension_numbers = #tpu.dot_dimension_numbers<[1], [0], [0], [1], [0, 0, 1, 1], [], []>} : vector<2x16xf32>, vector<16x128xf32>, vector<2x128xf32> -> vector<2x128xf32>
    %c0_53 = arith.constant 0 : index
    %c0_54 = arith.constant 0 : index
    %104 = vector.load %arg8[%c0_53, %c0_54] : memref<1x128xf32, #tpu.memory_space<vmem>>, vector<1x128xf32>
    %105 = vector.broadcast %104 : vector<1x128xf32> to vector<2x128xf32>
    %106 = arith.addf %103, %105 : vector<2x128xf32>
    %cst_55 = arith.constant 0.000000e+00 : f32
    %107 = vector.broadcast %cst_55 : f32 to vector<2x128xf32>
    %108 = arith.maximumf %106, %107 : vector<2x128xf32>
    %c0_56 = arith.constant 0 : index
    %c0_57 = arith.constant 0 : index
    %109 = vector.load %arg9[%c0_56, %c0_57] : memref<128x16xf32, #tpu.memory_space<vmem>>, vector<128x16xf32>
    %cst_58 = arith.constant dense<0.000000e+00> : vector<2x16xf32>
    %110 = tpu.matmul %108, %109, %cst_58 {dimension_numbers = #tpu.dot_dimension_numbers<[1], [0], [0], [1], [0, 0, 1, 1], [], []>} : vector<2x128xf32>, vector<128x16xf32>, vector<2x16xf32> -> vector<2x16xf32>
    %c0_59 = arith.constant 0 : index
    %c0_60 = arith.constant 0 : index
    %111 = vector.load %arg10[%c0_59, %c0_60] : memref<1x16xf32, #tpu.memory_space<vmem>>, vector<1x16xf32>
    %112 = vector.broadcast %111 : vector<1x16xf32> to vector<2x16xf32>
    %113 = arith.addf %110, %112 : vector<2x16xf32>
    %114 = arith.negf %113 : vector<2x16xf32>
    %115 = math.exp %114 : vector<2x16xf32>
    %cst_61 = arith.constant 1.000000e+00 : f32
    %116 = vector.broadcast %cst_61 : f32 to vector<2x16xf32>
    %117 = arith.addf %116, %115 : vector<2x16xf32>
    %118 = arith.divf %116, %117 : vector<2x16xf32>
    %119 = vector.shape_cast %118 : vector<2x16xf32> to vector<2x1x16xf32>
    %120 = vector.broadcast %119 : vector<2x1x16xf32> to vector<2x16x16xf32>
    %121 = arith.mulf %98, %120 : vector<2x16x16xf32>
    %c0_62 = arith.constant 0 : index
    %c0_63 = arith.constant 0 : index
    %c0_64 = arith.constant 0 : index
    %122 = vector.load %arg0[%c0_62, %c0_63, %c0_64] : memref<2x16x16xf32, #tpu.memory_space<vmem>>, vector<2x16x16xf32>
    %123 = arith.addf %121, %122 : vector<2x16x16xf32>
    %cst_65 = arith.constant 0.000000e+00 : f32
    %124 = vector.broadcast %cst_65 : f32 to vector<2x16x16xf32>
    %125 = arith.maximumf %123, %124 : vector<2x16x16xf32>
    %c0_66 = arith.constant 0 : index
    %c0_67 = arith.constant 0 : index
    %c0_68 = arith.constant 0 : index
    %126 = vector.load %arg11[%c0_66, %c0_67, %c0_68] : memref<2x16x16xf32, #tpu.memory_space<vmem>>, vector<2x16x16xf32>
    tpu.vector_store %arg11[%c0_66, %c0_67, %c0_68], %125 {strides = array<i32>} : memref<2x16x16xf32, #tpu.memory_space<vmem>>, vector<2x16x16xf32>,
    return
  }
}

</mosaic_0001>

<bundles_post_ra>
// kernel: tpu_custom_call.1
= control target key start
LH: loop header
LB: loop body
LE: loop exit
PB: predicated region body
PF: predicated region fallthrough
CT: control target
= control target key end

     0   :  { %16 = vsyncpa [#allocation3], 0  ;;  %s1893_s0 = inlined_call_operand.vmem [shape: f32[2,16,16], index: 0, kind: input, shape index: {}]   ;;  %s1894_s1 = inlined_call_operand.vmem [shape: f32[3,16,16], index: 1, kind: input, shape index: {}]   ;;  %s1895_s2 = inlined_call_operand.vmem [shape: f32[3,16,16], index: 2, kind: input, shape index: {}]   ;;  %s1896_s3 = inlined_call_operand.hbm [shape: f32[1,16], index: 3, kind: input, shape index: {}]   ;;  %s1897_s4 = inlined_call_operand.hbm [shape: f32[1,16], index: 4, kind: input, shape index: {}]   ;;  %s1898_s5 = inlined_call_operand.hbm [shape: f32[1,16], index: 5, kind: input, shape index: {}]   ;;  %s1899_s6 = inlined_call_operand.hbm [shape: f32[1,16], index: 6, kind: input, shape index: {}]   ;;  %s1900_s7 = inlined_call_operand.vmem [shape: f32[16,128], index: 7, kind: input, shape index: {}]   ;;  %s1901_s8 = inlined_call_operand.hbm [shape: f32[1,128], index: 8, kind: input, shape index: {}]   ;;  %s1902_s9 = inlined_call_operand.vmem [shape: f32[128,16], index: 9, kind: input, shape index: {}]   ;;  %s1903_s10 = inlined_call_operand.vmem [shape: f32[1,16], index: 10, kind: input, shape index: {}]   ;;  %s1904_s11 = inlined_call_operand.hbm [shape: f32[2,16,16], index: 11, kind: output, shape index: {}]  }
   0x1   :  { %17 = vsyncpa [#allocation6], 0 }
   0x2   :  { %18 = vsyncpa [#allocation9], 0 }
   0x3   :  { %19 = vsyncpa [#allocation4], 0  ;;  %s1523_s17 = smov [#allocation5]   ;;  %s1524_s19 = smov [#allocation8]  }
   0x4   :  { %s42_s18 = sshll.u32 %s1523_s17, 4  ;;  %s62_s20 = sshll.u32 %s1524_s19, 4  ;;  %s43_s18 = int_to_ptr.vmem [resolvable:$true] %s42_s18  ;;  %s63_s20 = int_to_ptr.vmem [resolvable:$true] %s62_s20 }
   0x5   :  { %s1403_s21 = scalar_lea.vmem %s43_s18, 16  ;;  %s1407_s22 = scalar_lea.vmem %s43_s18, 32 }
   0x6   :  { %p1404_p0 = scmp.ne.s32.totalorder %s43_s18, %s1403_s21  ;;  %p1408_p1 = scmp.lt.s32.totalorder %s43_s18, %s43_s18 }
   0x7   :  { %p1409_p2 = scmp.lt.s32.totalorder %s1407_s22, %s1403_s21 }
   0x9   :  { %p1410_p3 = por %p1409_p2, %p1408_p1 }
   0xb   :  { %p1411_p4 = pnand %p1410_p3, %p1404_p0 }
   0xd   :  { %1414 = shalt.err (!%p1411_p4)
}
   0xe   :  { %45 = dma.hbm_to_vmem [thread:$0]  %s1897_s4, 16, %s43_s18, [#allocation6]  }
   0xf   :  { %s1423_s25 = scalar_lea.vmem %s63_s20, 16  ;;  %s1427_s26 = scalar_lea.vmem %s63_s20, 32 }
  0x10   :  { %p1424_p5 = scmp.ne.s32.totalorder %s63_s20, %s1423_s25  ;;  %p1428_p6 = scmp.lt.s32.totalorder %s63_s20, %s63_s20 }
  0x11   :  { %p1429_p7 = scmp.lt.s32.totalorder %s1427_s26, %s1423_s25 }
  0x13   :  { %p1430_p8 = por %p1429_p7, %p1428_p6 }
  0x15   :  { %p1431_p9 = pnand %p1430_p8, %p1424_p5 }
  0x17   :  { %1434 = shalt.err (!%p1431_p9)
}
  0x18   :  { %65 = dma.hbm_to_vmem [thread:$0]  %s1899_s6, 16, %s63_s20, [#allocation9]  }
  0x19   :  { %s1525_s29 = smov [#allocation2]   ;;  %s1526_s12 = smov [#allocation7]  }
  0x1a   :  { %s32_s30 = sshll.u32 %s1525_s29, 4  ;;  %s52_s13 = sshll.u32 %s1526_s12, 4  ;;  %s33_s30 = int_to_ptr.vmem [resolvable:$true] %s32_s30  ;;  %s53_s13 = int_to_ptr.vmem [resolvable:$true] %s52_s13 }
  0x1b   :  { %s1443_s14 = scalar_lea.vmem %s33_s30, 16  ;;  %s1447_s4 = scalar_lea.vmem %s33_s30, 32 }
  0x1c   :  { %p1444_p10 = scmp.ne.s32.totalorder %s33_s30, %s1443_s14  ;;  %p1448_p11 = scmp.lt.s32.totalorder %s33_s30, %s33_s30 }
  0x1d   :  { %p1449_p12 = scmp.lt.s32.totalorder %s1447_s4, %s1443_s14 }
  0x1f   :  { %p1450_p13 = por %p1449_p12, %p1448_p11 }
  0x21   :  { %p1451_p0 = pnand %p1450_p13, %p1444_p10 }
  0x23   :  { %1454 = shalt.err (!%p1451_p0)
}
  0x24   :  { %35 = dma.hbm_to_vmem [thread:$0]  %s1896_s3, 16, %s33_s30, [#allocation3]  }
  0x25   :  { %s1463_s17 = scalar_lea.vmem %s53_s13, 16  ;;  %s1467_s6 = scalar_lea.vmem %s53_s13, 32 }
  0x26   :  { %p1464_p1 = scmp.ne.s32.totalorder %s53_s13, %s1463_s17  ;;  %p1468_p2 = scmp.lt.s32.totalorder %s53_s13, %s53_s13 }
  0x27   :  { %p1469_p3 = scmp.lt.s32.totalorder %s1467_s6, %s1463_s17 }
  0x29   :  { %p1470_p4 = por %p1469_p3, %p1468_p2 }
  0x2b   :  { %p1471_p5 = pnand %p1470_p4, %p1464_p1 }
  0x2d   :  { %1474 = shalt.err (!%p1471_p5)
}
  0x2e   :  { %55 = dma.hbm_to_vmem [thread:$0]  %s1898_s5, 16, %s53_s13, [#allocation6]  }
  0x2f   :  { %s1527_s20 = smov [#allocation10]  }
  0x30   :  { %s74_s21 = sshll.u32 %s1527_s20, 4  ;;  %s75_s21 = int_to_ptr.vmem [resolvable:$true] %s74_s21 }
  0x31   :  { %s1483_s22 = scalar_lea.vmem %s75_s21, 16  ;;  %s1487_s23 = scalar_lea.vmem %s75_s21, 32 }
  0x32   :  { %p1484_p6 = scmp.ne.s32.totalorder %s75_s21, %s1483_s22  ;;  %p1488_p7 = scmp.lt.s32.totalorder %s75_s21, %s75_s21 }
  0x33   :  { %p1489_p8 = scmp.lt.s32.totalorder %s1487_s23, %s1483_s22 }
  0x35   :  { %p1490_p9 = por %p1489_p8, %p1488_p7 }
  0x37   :  { %p1491_p10 = pnand %p1490_p9, %p1484_p6 }
  0x39   :  { %1494 = shalt.err (!%p1491_p10)
}
  0x3a   :  { %77 = dma.hbm_to_vmem [thread:$0]  %s1901_s8, 16, %s75_s21, [#allocation9]  }
  0x3b   :  { %1515 = dma.done.wait [#allocation3], 16  }
  0x3c   :  { %1516 = vsyncadd [#allocation3], 4294967280 }
  0x3d   :  { %1517 = dma.done.wait [#allocation6], 32  }
  0x3e   :  { %1518 = vsyncadd [#allocation6], 4294967264 }
  0x3f   :  { %1519 = dma.done.wait [#allocation9], 32  }
  0x40   :  { %1520 = vsyncadd [#allocation9], 4294967264  ;;  %v97_v0 = vlaneseq  ;;  %v146_v2 = vld [vmem:[%s1894_s1 + $0x8] sm:$0xff]  ;;  %v145_v3 = vld [vmem:[%s1894_s1] sm:$0xff]  ;;  %vm147_vm2 = vcmask 130048   ;;  %vm1529_vm5 = vmmov 0  }
  0x41   :  { %v1620_v4 = vld [vmem:[%s1893_s0] sm:$0xff]  ;;  %1270 = vmatprep.subr.mxu0 %v146_v2  ;;  %v1625_v5 = vld [vmem:[%s1893_s0 + $0x18] sm:$0xff]  ;;  %v1632_v7 = vld [vmem:[%s1893_s0 + $0x8] sm:$0xff]  ;;  %vm936_vm6 = vcmask 1041409  }
  0x42   :  { %v1609_v1 = vshrl.u32 %v97_v0, 7  ;;  %v108_v6 = vrot.slane %v1620_v4, 7  ;;  %1271 = vmatpush3.msra.mxu0 %v146_v2  ;;  %v111_v8 = vrot.slane %v1625_v5, 7  ;;  %v1179_v9 = vld [vmem:[%s1894_s1 + $0x18] sm:$0xff]  ;;  %v109_v10 = vrot.slane %v1632_v7, 7  ;;  %v1643_v11 = vld [vmem:[%s1893_s0 + $0x10] sm:$0xff] }
  0x43   :  { %1272 = vmatprep.subr.mxu0 %v145_v3  ;;  %v110_v12 = vrot.slane %v1643_v11, 7  ;;  %v1178_v18 = vld [vmem:[%s1894_s1 + $0x10] sm:$0xff]  ;;  %v1189_v20 = vld [vmem:[%s1894_s1 + $0x28] sm:$0xff]  ;;  %v125_v21 = vrot.slane %v1620_v4, 1  ;;  %v126_v22 = vrot.slane %v1632_v7, 1  ;;  %v127_v24 = vrot.slane %v1643_v11, 1 }
  0x44   :  { %vm112_vm0 = vcmp.lt.s32.totalorder %v1609_v1, 1  ;;  %vm100_vm1 = vcmp.eq.s32.totalorder %v1609_v1, 0  ;;  %1273 = vmatpush3.msra.mxu0 %v145_v3  ;;  %v1673_v23 = vadd.s32 8, %v1609_v1  ;;  %v1188_v25 = vld [vmem:[%s1894_s1 + $0x20] sm:$0xff]  ;;  %vm129_vm3 = vcmp.lt.s32.totalorder %v1609_v1, 7  ;;  %v542_v33 = vld [vmem:[%s1895_s2 + $0x8] sm:$0xff] }
  0x45   :  { %v116_v13 = vsel %vm112_vm0, %v111_v8, %v108_v6  ;;  %v115_v14 = vsel %vm112_vm0, %v108_v6, %v109_v10  ;;  %1280 = vmatprep.subr.mxu0 %v1179_v9  ;;  %v114_v16 = vsel %vm112_vm0, %v109_v10, %v110_v12  ;;  %v113_v19 = vsel %vm112_vm0, %v110_v12, %v111_v8  ;;  %v541_v34 = vld [vmem:[%s1895_s2] sm:$0xff]  ;;  %v1713_v35 = vld [vmem:[%s1895_s2 + $0x18] sm:$0xff]  ;;  %v1719_v36 = vld [vmem:[%s1895_s2 + $0x28] sm:$0xff] }
  0x46   :  { %v121_v15 = vsel %vm100_vm1, 0.0, %v116_v13  ;;  %v123_v17 = vsel %vm100_vm1, 0.0, %v114_v16  ;;  %v132_v26 = vsel %vm129_vm3, %v125_v21, %v126_v22  ;;  %vm103_vm4 = vcmp.eq.s32.totalorder %v1673_v23, 15  ;;  %1372 = vmatprep.subr.mxu1 %v542_v33  ;;  %v1026_v23 = vld [vmem:[%s1902_s9 + $0x78] sm:$0xff] }
  0x47   :  { %1274 = vmatprep.mubr.msk.f32.mxu0 %vm147_vm2, %v121_v15  ;;  %v131_v27 = vsel %vm129_vm3, %v126_v22, %v127_v24  ;;  %v128_v28 = vrot.slane %v1625_v5, 1  ;;  %1374 = vmatpush3.msra.mxu1 %v542_v33 }
  0x48   :  { %1275 = vmatmul.mubr.msk.f32.vlgmr.msra.gmra.mxu0 %vm147_vm2, %v115_v14  ;;  %v139_v29 = vsel %vm103_vm4, 0.0, %v131_v27  ;;  %1373 = vmatprep.subr.mxu1 %v541_v34 }
  0x49   :  { %1281 = vmatpush3.msra.mxu0 %v1179_v9  ;;  %1277 = vmatprep.mubr.msk.f32.mxu0 %vm147_vm2, %v123_v17  ;;  %v130_v30 = vsel %vm129_vm3, %v127_v24, %v128_v28  ;;  %v133_v31 = vsel %vm129_vm3, %v128_v28, %v125_v21 }
  0x4a   :  { %1282 = vmatprep.subr.mxu0 %v1178_v18  ;;  %v141_v32 = vsel %vm103_vm4, 0.0, %v133_v31  ;;  %1375 = vmatpush3.msra.mxu1 %v541_v34 }
  0x4b   :  { %1283 = vmatpush3.msra.mxu0 %v1178_v18  ;;  %1320 = vmatprep.subr.mxu1 %v1719_v36 }
  0x4c   :  { %1278 = vmatmul.mubr.msk.f32.gmra.mxu0 %vm147_vm2, %v113_v19  ;;  %1290 = vmatprep.subr.mxu0 %v1189_v20 }
  0x4d   :  { %1284 = vmatprep.mubr.msk.f32.mxu0 %vm147_vm2, %v1620_v4 }
  0x50   :  { %1285 = vmatmul.mubr.msk.f32.vlgmr.msra.gmra.mxu0 %vm147_vm2, %v1632_v7 }
  0x51   :  { %1291 = vmatpush3.msra.mxu0 %v1189_v20  ;;  %1287 = vmatprep.mubr.msk.f32.mxu0 %vm147_vm2, %v1643_v11 }
  0x52   :  { %1292 = vmatprep.subr.mxu0 %v1188_v25 }
  0x53   :  { %1293 = vmatpush3.msra.mxu0 %v1188_v25 }
  0x54   :  { %1288 = vmatmul.mubr.msk.f32.gmra.mxu0 %vm147_vm2, %v1625_v5  ;;  %1300 = vmatprep.subr.mxu0 %v542_v33 }
  0x55   :  { %1294 = vmatprep.mubr.msk.f32.mxu0 %vm147_vm2, %v132_v26 }
  0x58   :  { %1295 = vmatmul.mubr.msk.f32.vlgmr.msra.gmra.mxu0 %vm147_vm2, %v139_v29 }
  0x59   :  { %1297 = vmatprep.mubr.msk.f32.mxu0 %vm147_vm2, %v130_v30  ;;  %1301 = vmatpush3.msra.mxu0 %v542_v33 }
  0x5a   :  { %1302 = vmatprep.subr.mxu0 %v541_v34 }
  0x5b   :  { %1303 = vmatpush3.msra.mxu0 %v541_v34 }
  0x5c   :  { %1298 = vmatmul.mubr.msk.f32.gmra.mxu0 %vm147_vm2, %v141_v32  ;;  %1310 = vmatprep.subr.mxu0 %v1713_v35 }
 0x108   :  { %v1276_v37 = vpop.f32.mrf.mxu0 }
 0x10a   :  { %v226_v38 = vpop.f32.mrf.mxu0 }
 0x10c   :  { %v1279_v39 = vpop.f32.mrf.mxu0 }
 0x10e   :  { %v236_v40 = vpop.f32.mrf.mxu0 }
 0x110   :  { %v1286_v41 = vpop.f32.mrf.mxu0 }
 0x111   :  { %v329_v45 = vadd.f32 %v1286_v41, %v1276_v37 }
 0x112   :  { %v323_v42 = vpop.f32.mrf.mxu0 }
 0x113   :  { %v324_v47 = vadd.f32 %v323_v42, %v226_v38  ;;  %v487_v42 = vld [vmem:[#allocation2] sm:$0x1] }
 0x114   :  { %v1289_v43 = vpop.f32.mrf.mxu0 }
 0x115   :  { %v339_v50 = vadd.f32 %v1289_v43, %v1279_v39  ;;  %v1731_v43 = vsub.s32 0, %v1609_v1 }
 0x116   :  { %v333_v44 = vpop.f32.mrf.mxu0 }
 0x117   :  { %v334_v53 = vadd.f32 %v333_v44, %v236_v40 }
 0x118   :  { %v1296_v46 = vpop.f32.mrf.mxu0 }
 0x119   :  { %v443_v48 = vadd.f32 %v1296_v46, %v329_v45  ;;  %v491_v46 = vld [vmem:[#allocation5] sm:$0x1] }
 0x11a   :  { %v423_v49 = vpop.f32.mrf.mxu0 }
 0x11b   :  { %v442_v51 = vadd.f32 %v423_v49, %v324_v47  ;;  %v447_v54 = vmax.f32 %v443_v48, 0.0 }
 0x11c   :  { %v1299_v52 = vpop.f32.mrf.mxu0 }
 0x11d   :  { %v446_v55 = vmax.f32 %v442_v51, 0.0  ;;  %v445_v56 = vadd.f32 %v1299_v52, %v339_v50  ;;  %v451_v60 = vsel %vm147_vm2, %v447_v54, 0.0 }
 0x11e   :  { %v433_v57 = vpop.f32.mrf.mxu0 }
 0x11f   :  { %v450_v58 = vsel %vm147_vm2, %v446_v55, 0.0  ;;  %v444_v59 = vadd.f32 %v433_v57, %v334_v53  ;;  %v449_v61 = vmax.f32 %v445_v56, 0.0 }
 0x120   :  { %v452_v63 = vadd.f32 %v451_v60, %v450_v58 }
 0x121   :  { %v448_v62 = vmax.f32 %v444_v59, 0.0  ;;  %v455_v3 = vsel %vm147_vm2, %v449_v61, 0.0 }
 0x123   :  { %v453_v0 = vsel %vm147_vm2, %v448_v62, 0.0 }
 0x124   :  { %v454_v2 = vadd.f32 %v453_v0, %v452_v63 }
 0x126   :  { %v456_v6 = vadd.f32 %v455_v3, %v454_v2 }
 0x128   :  { %v457_v8 = vrot.slane %v456_v6, 4 }
 0x12a   :  { %v458_v9 = vadd.f32 %v457_v8, %v456_v6 }
 0x12c   :  { %v459_v10 = vrot.slane %v458_v9, 2 }
 0x12e   :  { %v460_v12 = vadd.f32 %v459_v10, %v458_v9 }
 0x130   :  { %v461_v13 = vrot.slane %v460_v12, 1 }
 0x132   :  { %v462_v14 = vadd.f32 %v461_v13, %v460_v12 }
 0x134   :  { %v464_v15 = vmul.f32 0.03125, %v462_v14  ;;  %v1194_v14 = vld [vmem:[%s1895_s2 + $0x10] sm:$0xff] }
 0x136   :  { %v465_v16 = vsub.f32 %v446_v55, %v464_v15  ;;  %v466_v17 = vsub.f32 %v447_v54, %v464_v15  ;;  %v467_v18 = vsub.f32 %v448_v62, %v464_v15  ;;  %v468_v19 = vsub.f32 %v449_v61, %v464_v15 }
 0x138   :  { %v469_v20 = vmul.f32 %v465_v16, %v465_v16  ;;  %v470_v21 = vmul.f32 %v466_v17, %v466_v17  ;;  %v471_v22 = vmul.f32 %v467_v18, %v467_v18  ;;  %v472_v24 = vmul.f32 %v468_v19, %v468_v19  ;;  %v1204_v16 = vld [vmem:[%s1895_s2 + $0x20] sm:$0xff] }
 0x13a   :  { %v473_v25 = vsel %vm147_vm2, %v469_v20, 0.0  ;;  %v474_v26 = vsel %vm147_vm2, %v470_v21, 0.0  ;;  %v476_v28 = vsel %vm147_vm2, %v471_v22, 0.0  ;;  %v478_v30 = vsel %vm147_vm2, %v472_v24, 0.0  ;;  %v926_v20 = vld [vmem:[%s1900_s7 + $0x8] sm:$0xff]  ;;  %v925_v22 = vld [vmem:[%s1900_s7] sm:$0xff] }
 0x13b   :  { %v475_v27 = vadd.f32 %v474_v26, %v473_v25  ;;  %v1528_v21 = vmov 0.0   ;;  %v1025_v24 = vld [vmem:[%s1902_s9 + $0x70] sm:$0xff]  ;;  %v1024_v25 = vld [vmem:[%s1902_s9 + $0x68] sm:$0xff]  ;;  %v1023_v26 = vld [vmem:[%s1902_s9 + $0x60] sm:$0xff] }
 0x13d   :  { %v477_v29 = vadd.f32 %v476_v28, %v475_v27  ;;  %v1022_v27 = vld [vmem:[%s1902_s9 + $0x58] sm:$0xff]  ;;  %v1021_v28 = vld [vmem:[%s1902_s9 + $0x50] sm:$0xff] }
 0x13f   :  { %v479_v31 = vadd.f32 %v478_v30, %v477_v29  ;;  %v1020_v29 = vld [vmem:[%s1902_s9 + $0x48] sm:$0xff]  ;;  %v1019_v30 = vld [vmem:[%s1902_s9 + $0x40] sm:$0xff] }
 0x141   :  { %v480_v32 = vrot.slane %v479_v31, 4 }
 0x143   :  { %v481_v33 = vadd.f32 %v480_v32, %v479_v31  ;;  %v1018_v31 = vld [vmem:[%s1902_s9 + $0x38] sm:$0xff]  ;;  %v1017_v32 = vld [vmem:[%s1902_s9 + $0x30] sm:$0xff] }
 0x145   :  { %v482_v34 = vrot.slane %v481_v33, 2 }
 0x147   :  { %v483_v37 = vadd.f32 %v482_v34, %v481_v33  ;;  %v1016_v33 = vld [vmem:[%s1902_s9 + $0x28] sm:$0xff]  ;;  %v1015_v34 = vld [vmem:[%s1902_s9 + $0x20] sm:$0xff] }
 0x149   :  { %v484_v38 = vrot.slane %v483_v37, 1 }
 0x14b   :  { %v485_v39 = vadd.f32 %v484_v38, %v483_v37  ;;  %v1014_v37 = vld [vmem:[%s1902_s9 + $0x18] sm:$0xff] }
 0x14d   :  { %v486_v40 = vmul.f32 0.03125, %v485_v39 }
 0x14f   :  { %v488_v41 = vadd.f32 1e-05, %v486_v40 }
 0x151   :  { %1387 = vrsqrt.f32 %v488_v41 }
 0x15e   :  { %v1388_v44 = vpop.eup %1387 }
 0x15f   :  { %v490_v45 = vmul.f32 %v1388_v44, %v487_v42 }
 0x161   :  { %v492_v47 = vmul.f32 %v490_v45, %v464_v15  ;;  %v498_v48 = vrot.slane %v490_v45, %v1731_v43 }
 0x163   :  { %v493_v49 = vsub.f32 %v491_v46, %v492_v47  ;;  %v502_v50 = vmul.f32 %v498_v48, %v448_v62  ;;  %v500_v52 = vmul.f32 %v498_v48, %v446_v55  ;;  %v503_v53 = vmul.f32 %v498_v48, %v449_v61 }
 0x164   :  { %v501_v56 = vmul.f32 %v498_v48, %v447_v54 }
 0x165   :  { %v508_v51 = vrot.slane %v493_v49, %v1731_v43 }
 0x167   :  { %v512_v57 = vadd.f32 %v508_v51, %v502_v50  ;;  %v510_v58 = vadd.f32 %v508_v51, %v500_v52  ;;  %v513_v59 = vadd.f32 %v508_v51, %v503_v53  ;;  %v511_v60 = vadd.f32 %v508_v51, %v501_v56 }
 0x169   :  { %v514_v63 = vrot.slane %v510_v58, 7  ;;  %v517_v0 = vrot.slane %v513_v59, 7  ;;  %v515_v2 = vrot.slane %v511_v60, 7  ;;  %v516_v3 = vrot.slane %v512_v57, 7 }
 0x16a   :  { %v528_v6 = vrot.slane %v512_v57, 1  ;;  %v529_v8 = vrot.slane %v513_v59, 1  ;;  %v526_v10 = vrot.slane %v510_v58, 1  ;;  %v527_v12 = vrot.slane %v511_v60, 1 }
 0x16b   :  { %v521_v9 = vsel %vm112_vm0, %v517_v0, %v514_v63  ;;  %v519_v62 = vsel %vm112_vm0, %v515_v2, %v516_v3  ;;  %v518_v55 = vsel %vm112_vm0, %v516_v3, %v517_v0  ;;  %v520_v13 = vsel %vm112_vm0, %v514_v63, %v515_v2 }
 0x16c   :  { %v522_v54 = vsel %vm100_vm1, 0.0, %v521_v9  ;;  %v524_v61 = vsel %vm100_vm1, 0.0, %v519_v62  ;;  %v530_v15 = vsel %vm129_vm3, %v528_v6, %v529_v8  ;;  %v532_v17 = vsel %vm129_vm3, %v526_v10, %v527_v12 }
 0x16d   :  { %1304 = vmatprep.mubr.msk.f32.mxu0 %vm147_vm2, %v522_v54  ;;  %1307 = vmatprep.mubr.msk.f32.mxu1 %vm147_vm2, %v524_v61  ;;  %v531_v18 = vsel %vm129_vm3, %v527_v12, %v528_v6 }
 0x16e   :  { %1305 = vmatmul.mubr.msk.f32.vlgmr.msra.gmra.mxu0 %vm147_vm2, %v520_v13  ;;  %1308 = vmatmul.mubr.msk.f32.vlgmr.msra.gmra.mxu1 %vm147_vm2, %v518_v55 }
 0x16f   :  { %1311 = vmatpush3.msra.mxu0 %v1713_v35  ;;  %1314 = vmatprep.mubr.msk.f32.mxu0 %vm147_vm2, %v510_v58  ;;  %v535_v35 = vsel %vm103_vm4, 0.0, %v531_v18 }
 0x170   :  { %1312 = vmatprep.subr.mxu0 %v1194_v14  ;;  %1321 = vmatpush3.msra.mxu1 %v1719_v36  ;;  %v533_v36 = vsel %vm129_vm3, %v529_v8, %v526_v10 }
 0x171   :  { %1324 = vmatprep.mubr.msk.f32.mxu1 %vm147_vm2, %v532_v17  ;;  %1313 = vmatpush3.msra.mxu0 %v1194_v14  ;;  %v537_v19 = vsel %vm103_vm4, 0.0, %v533_v36 }
 0x172   :  { %1322 = vmatprep.subr.mxu1 %v1204_v16  ;;  %1315 = vmatmul.mubr.msk.f32.vlgmr.msra.gmra.mxu0 %vm147_vm2, %v511_v60 }
 0x173   :  { %1323 = vmatpush3.msra.mxu1 %v1204_v16  ;;  %1317 = vmatprep.mubr.msk.f32.mxu0 %vm147_vm2, %v512_v57 }
 0x174   :  { %1325 = vmatmul.mubr.msk.f32.vlgmr.msra.gmra.mxu1 %vm147_vm2, %v535_v35  ;;  %1330 = vmatprep.subr.mxu0 %v1528_v21 }
 0x175   :  { %1327 = vmatprep.mubr.msk.f32.mxu1 %vm147_vm2, %v530_v15  ;;  %1331 = vmatpush3.msra.mxu0 %v926_v20 }
 0x176   :  { %1318 = vmatmul.mubr.msk.f32.gmra.mxu0 %vm147_vm2, %v513_v59  ;;  %1337 = vmatprep.subr.mxu1 %v1528_v21 }
 0x177   :  { %1334 = vmatprep.mubr.msk.f32.mxu0 %vm1529_vm5, %v1528_v21  ;;  %1332 = vmatprep.subr.mxu0 %v1528_v21 }
 0x178   :  { %1328 = vmatmul.mubr.msk.f32.gmra.mxu1 %vm147_vm2, %v537_v19  ;;  %1333 = vmatpush3.msra.mxu0 %v925_v22 }
 0x179   :  { %1369 = vmatprep.mubr.msk.f32.mxu1 %vm1529_vm5, %v1528_v21  ;;  %1338 = vmatpush3.msra.mxu1 %v1026_v23 }
 0x17a   :  { %1339 = vmatprep.subr.mxu1 %v1528_v21 }
 0x17b   :  { %1340 = vmatpush3.msra.mxu1 %v1025_v24 }
 0x17c   :  { %1341 = vmatprep.subr.mxu1 %v1528_v21 }
 0x17d   :  { %1342 = vmatpush3.msra.mxu1 %v1024_v25 }
 0x17e   :  { %1343 = vmatprep.subr.mxu1 %v1528_v21 }
 0x17f   :  { %1344 = vmatpush3.msra.mxu1 %v1023_v26 }
 0x180   :  { %1345 = vmatprep.subr.mxu1 %v1528_v21 }
 0x181   :  { %1346 = vmatpush3.msra.mxu1 %v1022_v27 }
 0x182   :  { %1347 = vmatprep.subr.mxu1 %v1528_v21 }
 0x183   :  { %1348 = vmatpush3.msra.mxu1 %v1021_v28 }
 0x184   :  { %1349 = vmatprep.subr.mxu1 %v1528_v21 }
 0x185   :  { %1350 = vmatpush3.msra.mxu1 %v1020_v29 }
 0x186   :  { %1351 = vmatprep.subr.mxu1 %v1528_v21 }
 0x187   :  { %1352 = vmatpush3.msra.mxu1 %v1019_v30 }
 0x188   :  { %1353 = vmatprep.subr.mxu1 %v1528_v21 }
 0x189   :  { %1354 = vmatpush3.msra.mxu1 %v1018_v31 }
 0x18a   :  { %1355 = vmatprep.subr.mxu1 %v1528_v21 }
 0x18b   :  { %1356 = vmatpush3.msra.mxu1 %v1017_v32 }
 0x18c   :  { %1357 = vmatprep.subr.mxu1 %v1528_v21 }
 0x18d   :  { %1358 = vmatpush3.msra.mxu1 %v1016_v33 }
 0x18e   :  { %1359 = vmatprep.subr.mxu1 %v1528_v21 }
 0x18f   :  { %1360 = vmatpush3.msra.mxu1 %v1015_v34 }
 0x190   :  { %1361 = vmatprep.subr.mxu1 %v1528_v21 }
 0x191   :  { %1362 = vmatpush3.msra.mxu1 %v1014_v37 }
 0x192   :  { %1363 = vmatprep.subr.mxu1 %v1528_v21 }
 0x22e   :  { %v1306_v38 = vpop.f32.mrf.mxu0  ;;  %v1309_v39 = vpop.f32.mrf.mxu1 }
 0x230   :  { %v621_v40 = vpop.f32.mrf.mxu0  ;;  %v631_v41 = vpop.f32.mrf.mxu1 }
 0x232   :  { %v1316_v42 = vpop.f32.mrf.mxu0 }
 0x233   :  { %v724_v44 = vadd.f32 %v1316_v42, %v1306_v38  ;;  %v877_v38 = vld [vmem:[#allocation7] sm:$0x1] }
 0x234   :  { %v1326_v45 = vpop.f32.mrf.mxu1  ;;  %v718_v46 = vpop.f32.mrf.mxu0 }
 0x235   :  { %v719_v47 = vadd.f32 %v718_v46, %v621_v40  ;;  %v838_v50 = vadd.f32 %v1326_v45, %v724_v44 }
 0x236   :  { %v818_v48 = vpop.f32.mrf.mxu1  ;;  %v1319_v49 = vpop.f32.mrf.mxu0 }
 0x237   :  { %v837_v51 = vadd.f32 %v818_v48, %v719_v47  ;;  %v734_v52 = vadd.f32 %v1319_v49, %v1309_v39  ;;  %v842_v60 = vsel %vm147_vm2, %v838_v50, 0.0 }
 0x238   :  { %v1329_v53 = vpop.f32.mrf.mxu1  ;;  %v728_v56 = vpop.f32.mrf.mxu0 }
 0x239   :  { %v841_v57 = vsel %vm147_vm2, %v837_v51, 0.0  ;;  %v729_v58 = vadd.f32 %v728_v56, %v631_v41  ;;  %v840_v63 = vadd.f32 %v1329_v53, %v734_v52  ;;  %v881_v41 = vld [vmem:[#allocation8] sm:$0x1] }
 0x23a   :  { %v828_v59 = vpop.f32.mrf.mxu1  ;;  %v843_v2 = vadd.f32 %v842_v60, %v841_v57 }
 0x23b   :  { %v839_v0 = vadd.f32 %v828_v59, %v729_v58  ;;  %v846_v8 = vsel %vm147_vm2, %v840_v63, 0.0 }
 0x23d   :  { %v844_v3 = vsel %vm147_vm2, %v839_v0, 0.0 }
 0x23e   :  { %v845_v6 = vadd.f32 %v844_v3, %v843_v2 }
 0x240   :  { %v847_v9 = vadd.f32 %v846_v8, %v845_v6 }
 0x242   :  { %v848_v62 = vrot.slane %v847_v9, 4 }
 0x244   :  { %v849_v55 = vadd.f32 %v848_v62, %v847_v9 }
 0x246   :  { %v850_v54 = vrot.slane %v849_v55, 2 }
 0x248   :  { %v851_v61 = vadd.f32 %v850_v54, %v849_v55 }
 0x24a   :  { %v852_v10 = vrot.slane %v851_v61, 1 }
 0x24c   :  { %v853_v12 = vadd.f32 %v852_v10, %v851_v61 }
 0x24e   :  { %v854_v13 = vmul.f32 0.03125, %v853_v12 }
 0x250   :  { %v855_v14 = vsub.f32 %v837_v51, %v854_v13  ;;  %v856_v15 = vsub.f32 %v838_v50, %v854_v13  ;;  %v857_v16 = vsub.f32 %v839_v0, %v854_v13  ;;  %v858_v17 = vsub.f32 %v840_v63, %v854_v13 }
 0x252   :  { %v859_v18 = vmul.f32 %v855_v14, %v855_v14  ;;  %v860_v35 = vmul.f32 %v856_v15, %v856_v15  ;;  %v861_v36 = vmul.f32 %v857_v16, %v857_v16  ;;  %v862_v19 = vmul.f32 %v858_v17, %v858_v17  ;;  %v1013_v17 = vld [vmem:[%s1902_s9 + $0x10] sm:$0xff] }
 0x253   :  { %1364 = vmatpush3.msra.mxu1 %v1013_v17 }
 0x254   :  { %v863_v20 = vsel %vm147_vm2, %v859_v18, 0.0  ;;  %v864_v22 = vsel %vm147_vm2, %v860_v35, 0.0  ;;  %v866_v24 = vsel %vm147_vm2, %v861_v36, 0.0  ;;  %v868_v26 = vsel %vm147_vm2, %v862_v19, 0.0  ;;  %1365 = vmatprep.subr.mxu1 %v1528_v21  ;;  %v1012_v18 = vld [vmem:[%s1902_s9 + $0x8] sm:$0xff]  ;;  %v1011_v35 = vld [vmem:[%s1902_s9] sm:$0xff] }
 0x255   :  { %v865_v23 = vadd.f32 %v864_v22, %v863_v20  ;;  %1366 = vmatpush3.msra.mxu1 %v1012_v18  ;;  %v1210_v36 = vld [vmem:[#allocation10] ss:$0 sm:$0xff]  ;;  %s1531_s9 = smov [#allocation11]  }
 0x256   :  { %1367 = vmatprep.subr.mxu1 %v1528_v21  ;;  %v1530_v21 = vmov 1966171168  }
 0x257   :  { %v867_v25 = vadd.f32 %v866_v24, %v865_v23  ;;  %1368 = vmatpush3.msra.mxu1 %v1011_v35  ;;  %v1212_v24 = vld [vmem:[%s1903_s10] ss:$0 sm:$0xff]  ;;  %s1164_s10 = sshll.u32 %s1531_s9, 4  ;;  %s1165_s10 = int_to_ptr.vmem [resolvable:$true] %s1164_s10 }
 0x258   :  { %s1495_s0 = scalar_lea.vmem %s1165_s10, 512  ;;  %p1500_p12 = scmp.lt.s32.totalorder %s1165_s10, %s1165_s10 }
 0x259   :  { %v869_v27 = vadd.f32 %v868_v26, %v867_v25  ;;  %p1496_p11 = scmp.ne.s32.totalorder %s1165_s10, %s1495_s0  ;;  %p1501_p13 = scmp.lt.s32.totalorder %s1495_s0, %s1495_s0 }
 0x25b   :  { %v870_v28 = vrot.slane %v869_v27, 4  ;;  %p1502_p0 = por %p1501_p13, %p1500_p12 }
 0x25d   :  { %v871_v29 = vadd.f32 %v870_v28, %v869_v27  ;;  %p1503_p1 = pnand %p1502_p0, %p1496_p11 }
 0x25f   :  { %v872_v30 = vrot.slane %v871_v29, 2 }
 0x261   :  { %v873_v31 = vadd.f32 %v872_v30, %v871_v29 }
 0x263   :  { %v874_v32 = vrot.slane %v873_v31, 1 }
 0x265   :  { %v875_v33 = vadd.f32 %v874_v32, %v873_v31  ;;  %v1112_v31 = vunpack.c.l.s4 %v1530_v21 }
 0x267   :  { %v876_v34 = vmul.f32 0.03125, %v875_v33  ;;  %v1113_v32 = vunpack.c.0.s8 %v1112_v31 }
 0x269   :  { %v878_v37 = vadd.f32 1e-05, %v876_v34  ;;  %v1116_v33 = vsub.s32 %v1113_v32, %v1609_v1 }
 0x26b   :  { %1389 = vrsqrt.f32 %v878_v37 }
 0x278   :  { %v1390_v39 = vpop.eup %1389 }
 0x279   :  { %v880_v40 = vmul.f32 %v1390_v39, %v877_v38 }
 0x27b   :  { %v882_v42 = vmul.f32 %v880_v40, %v854_v13  ;;  %v888_v44 = vrot.slane %v880_v40, %v1731_v43 }
 0x27d   :  { %v883_v45 = vsub.f32 %v881_v41, %v882_v42  ;;  %v890_v46 = vmul.f32 %v888_v44, %v837_v51  ;;  %v891_v47 = vmul.f32 %v888_v44, %v838_v50  ;;  %v892_v48 = vmul.f32 %v888_v44, %v839_v0 }
 0x27e   :  { %v893_v49 = vmul.f32 %v888_v44, %v840_v63 }
 0x27f   :  { %v898_v52 = vrot.slane %v883_v45, %v1731_v43 }
 0x281   :  { %v1852_v53 = vadd.f32 %v898_v52, %v892_v48  ;;  %v1854_v56 = vadd.f32 %v898_v52, %v893_v49  ;;  %v900_v57 = vadd.f32 %v898_v52, %v890_v46  ;;  %v901_v58 = vadd.f32 %v898_v52, %v891_v47 }
 0x283   :  { %v913_v59 = vsel %vm147_vm2, %v1852_v53, 0.0  ;;  %v914_v60 = vsel %vm147_vm2, %v1854_v56, 0.0  ;;  %v904_v2 = vsel %vm147_vm2, %v900_v57, 0.0  ;;  %v905_v50 = vsel %vm147_vm2, %v901_v58, 0.0 }
 0x284   :  { %v915_v51 = vadd.f32 %v914_v60, %v913_v59  ;;  %v906_v63 = vadd.f32 %v905_v50, %v904_v2 }
 0x286   :  { %v916_v0 = vrot.slane %v915_v51, 4  ;;  %v907_v3 = vrot.slane %v906_v63, 4 }
 0x288   :  { %v917_v6 = vadd.f32 %v916_v0, %v915_v51  ;;  %v908_v8 = vadd.f32 %v907_v3, %v906_v63 }
 0x28a   :  { %v918_v9 = vrot.slane %v917_v6, 2  ;;  %v909_v62 = vrot.slane %v908_v8, 2 }
 0x28c   :  { %v919_v55 = vadd.f32 %v918_v9, %v917_v6  ;;  %v910_v54 = vadd.f32 %v909_v62, %v908_v8 }
 0x28e   :  { %v911_v61 = vrot.slane %v910_v54, 1  ;;  %v920_v10 = vrot.slane %v919_v55, 1 }
 0x290   :  { %v912_v12 = vadd.f32 %v911_v61, %v910_v54  ;;  %v921_v13 = vadd.f32 %v920_v10, %v919_v55 }
 0x292   :  { %v923_v14 = vmul.f32 0.0625, %v912_v12  ;;  %v924_v15 = vmul.f32 0.0625, %v921_v13 }
 0x294   :  { %v937_v16 = vsel %vm936_vm6, %v924_v15, %v923_v14 }
 0x295   :  { %1335 = vmatmul.mubr.msk.f32.vlgmr.msra.gmra.mxu0 %vm147_vm2, %v937_v16 }
 0x355   :  { %v1006_v19 = vpop.f32.mrf.mxu0 }
 0x356   :  { %v1007_v20 = vadd.f32 %v1210_v36, %v1006_v19 }
 0x357   :  { %v1336_v22 = vpop.f32.mrf.mxu0 }
 0x358   :  { %v1010_v23 = vmax.f32 %v1007_v20, 0.0 }
 0x35a   :  { %1370 = vmatmul.mubr.f32.vlgmr.msra.gmra.mxu1 %v1010_v23 }
 0x41a   :  { %v1100_v25 = vpop.f32.mrf.mxu1 }
 0x41b   :  { %v1101_v26 = vadd.f32 %v1212_v24, %v1100_v25 }
 0x41c   :  { %v1371_v27 = vpop.f32.mrf.mxu1 }
 0x41d   :  { %v1213_v28 = vmul.f32 -1.442695, %v1101_v26 }
 0x41f   :  { %1391 = vpow2.f32 %v1213_v28 }
 0x42c   :  { %v1392_v29 = vpop.eup %1391 }
 0x42d   :  { %v1107_v30 = vadd.f32 1.0, %v1392_v29 }
 0x42f   :  { %1393 = vrcp.f32 %v1107_v30 }
 0x43c   :  { %v1394_v34 = vpop.eup %1393 }
 0x43d   :  { %v1117_v37 = vrot.slane %v1394_v34, %v1116_v33 }
 0x43f   :  { %v1118_v38 = vcombine.high %v1117_v37, %v1117_v37  ;;  %v1125_v39 = vrot.slane %v1117_v37, %v1116_v33 }
 0x441   :  { %v1132_v40 = vrot.slane %v1118_v38, %v1116_v33  ;;  %v1136_v41 = vrot.slane %v1125_v39, %v1731_v43 }
 0x443   :  { %v1140_v42 = vrot.slane %v1132_v40, %v1731_v43  ;;  %v1143_v44 = vmul.f32 %v1136_v41, %v900_v57  ;;  %v1144_v45 = vmul.f32 %v1136_v41, %v901_v58 }
 0x445   :  { %v1145_v46 = vmul.f32 %v1140_v42, %v1852_v53  ;;  %v1146_v47 = vmul.f32 %v1140_v42, %v1854_v56  ;;  %v1147_v48 = vadd.f32 %v1143_v44, %v1620_v4  ;;  %v1148_v49 = vadd.f32 %v1144_v45, %v1632_v7 }
 0x447   :  { %v1149_v1 = vadd.f32 %v1145_v46, %v1643_v11  ;;  %v1150_v52 = vadd.f32 %v1146_v47, %v1625_v5  ;;  %v1151_v59 = vmax.f32 %v1147_v48, 0.0  ;;  %v1152_v60 = vmax.f32 %v1148_v49, 0.0 }
 0x449   :  { %v1153_v2 = vmax.f32 %v1149_v1, 0.0  ;;  %v1154_v43 = vmax.f32 %v1150_v52, 0.0  ;;  %1155 = vst.msk [vmem:[#allocation11] sm:$0xff] %vm147_vm2, %v1151_v59  ;;  %1156 = vst.msk [vmem:[#allocation11 + $0x8] sm:$0xff] %vm147_vm2, %v1152_v60 }
 0x44b   :  { %1157 = vst.msk [vmem:[#allocation11 + $0x10] sm:$0xff] %vm147_vm2, %v1153_v2  ;;  %1158 = vst.msk [vmem:[#allocation11 + $0x18] sm:$0xff] %vm147_vm2, %v1154_v43 }
 0x44c   :  { %1506 = shalt.err (!%p1503_p1)
}
 0x44d   :  { %s1532_s17 = smov 128   ;;  %s1533_s6 = smov 8  }
 0x44e   :  { %1170 = dma.vmem_to_hbm [thread:$0]  %s1165_s10, 512, %s1904_s11, [#allocation4], %s1532_s17, %s1532_s17, %s1533_s6  }
 0x44f   :  { %1521 = dma.done.wait [#allocation4], 512  }
 0x450   :  { %1522 = vsyncadd [#allocation4], 4294966784 }
 0x451   :  { %1174 = vsyncpa [#allocation3], 1 }
 0x452   :  { %1175 = vsyncpa [#allocation6], 1 }
 0x453   :  { %1176 = vsyncpa [#allocation9], 1 }
 0x454   :  { %1177 = vsyncpa [#allocation4], 1 }

</bundles_post_ra>
